<compile_context>
chip_gen: v6e
topology: v6e:2x2x1
jax: 0.10.0
libtpu: 0.0.40
codegen_flags: <defaults>
</compile_context>

<pallas_src>
import functools
import math

import jax
import jax.numpy as jnp
from jax.experimental import pallas as pl
from jax.experimental.pallas import tpu as pltpu


# ----------------------------------------------------------------------------
# Pallas kernel: one (batch, tgt-tile) grid step does the whole attention.
# ----------------------------------------------------------------------------
def _attention_kernel(q_in_ref, kv_in_ref,
                      wq_ref, bq_ref, wk_ref, wv_ref, wo_ref, bo_ref,
                      out_ref, k_scr, v_scr,
                      *, num_heads, head_dim, cache_kv):
    # q_in_ref : (1, bt, E) bf16      kv_in_ref: (1, S, E) bf16
    # wq/wk/wv : (E, E) bf16 (W^T, head-major columns; wq pre-scaled by 1/sqrt(D))
    # bq_ref   : (1, E) f32 (pre-scaled)   wo_ref: (E, O) bf16    bo_ref: (1, O) f32
    # out_ref  : (1, bt, O)
    # k_scr/v_scr : (S, E) bf16 VMEM scratch holding the projected K / V.
    t = pl.program_id(1)
    H, D = num_heads, head_dim

    def _project_kv():
        x_kv = kv_in_ref[0]                                       # (S, E) bf16
        # Key bias dropped (cancels in softmax); value bias folded into bo.
        k_scr[...] = jnp.dot(x_kv, wk_ref[...],
                             preferred_element_type=jnp.float32).astype(k_scr.dtype)
        v_scr[...] = jnp.dot(x_kv, wv_ref[...],
                             preferred_element_type=jnp.float32).astype(v_scr.dtype)

    if cache_kv:
        # K/V depend only on the batch row; recompute only on its first t-tile.
        pl.when(t == 0)(_project_kv)
    else:
        _project_kv()

    # Q projection, full MXU width (N = E).  Scale + bias pre-folded.
    q = jnp.dot(q_in_ref[0], wq_ref[...],
                preferred_element_type=jnp.float32) + bq_ref[...]   # (bt, E) f32

    # Per-head scaled dot-product attention (statically unrolled head loop).
    xs = []
    for h in range(H):
        lo, hi = h * D, (h + 1) * D
        qh = q[:, lo:hi].astype(jnp.bfloat16)                       # (bt, D)
        kh = k_scr[:, lo:hi]                                        # (S, D) bf16
        vh = v_scr[:, lo:hi]                                        # (S, D) bf16

        s = jnp.einsum("td,sd->ts", qh, kh,
                       preferred_element_type=jnp.float32)          # (bt, S) f32
        m = jnp.max(s, axis=-1, keepdims=True)
        p = jnp.exp(s - m)
        l = jnp.sum(p, axis=-1, keepdims=True)
        xh = jnp.dot(p.astype(jnp.bfloat16), vh,
                     preferred_element_type=jnp.float32)            # (bt, D) f32
        # Normalize after PV (D <= S), EUP approximate reciprocal (free slot).
        xh = xh * pl.reciprocal(l, approx=True)
        xs.append(xh.astype(jnp.bfloat16))

    x = jnp.concatenate(xs, axis=-1)                                # (bt, E) bf16
    # out_proj with the full K = E contraction; single lane-dense store.
    out = jnp.dot(x, wo_ref[...],
                  preferred_element_type=jnp.float32) + bo_ref[...]
    out_ref[0] = out.astype(out_ref.dtype)


# ----------------------------------------------------------------------------
# Wrapper
# ----------------------------------------------------------------------------
def _pick_tgt_block(tgt):
    for cand in (512, 256, 128, 64, 32, 16, 8):
        if tgt % cand == 0:
            return cand
    return tgt  # odd length: single full-extent tile (allowed by BlockSpec rules)


def fast_clip_attention2_forward(query_states, kv_states,
                                 wq, bq, wkv, bkv, wo, bo,
                                 *, num_heads, out_seq_len=None,
                                 compute_dtype=jnp.bfloat16, block_tgt=None,
                                 cache_kv=True):
    """query_states: (B, Tq, E), kv_states: (B, S, E).
    wq: (E, E), bq: (E,)           -- q_proj (PyTorch Linear layout)
    wkv: (2E, E), bkv: (2E,)       -- kv_proj
    wo: (O, E), bo: (O,)           -- out_proj
    Returns (B, T, O) where T = out_seq_len or S."""
    B, S, E = kv_states.shape
    H = num_heads
    D = E // H
    assert D * H == E, "embed_dim must be divisible by num_attention_heads"
    O = wo.shape[0]
    T = out_seq_len if out_seq_len is not None else S
    assert T <= query_states.shape[1], "out_seq_len exceeds query sequence length"
    bt = block_tgt if block_tgt is not None else _pick_tgt_block(T)
    assert T % bt == 0
    nt = T // bt

    # --- parameter prep (pure layout/fold work; hoistable to weight-load) -----
    scale = 1.0 / math.sqrt(D)
    wq_r = (wq.T * scale).astype(compute_dtype)                 # (E, E), scaled
    bq_r = (bq * scale).reshape(1, E).astype(jnp.float32)
    wk_r = wkv[:E].T.astype(compute_dtype)                      # (E, E); bk dropped
    wv_r = wkv[E:].T.astype(compute_dtype)                      # (E, E)
    bv = bkv[E:].astype(jnp.float32)
    wo_r = wo.T.astype(compute_dtype)                           # (E, O)
    # Fold the value bias through out_proj (softmax rows sum to 1).
    bo_r = (bo.astype(jnp.float32)
            + wo.astype(jnp.float32) @ bv).reshape(1, O)

    # Activations: only truncation (module semantics) + bf16 cast, no reshapes.
    q_in = query_states[:, :T].astype(compute_dtype)
    kv_in = kv_states.astype(compute_dtype)

    # TODO(synk): norm_qk=True (LayerNorm over embed_dim on q/k) is not
    # implemented; default norm_qk=False only.
    # TODO(synk): for very long src_len, replace the full (S, E) KV residency
    # with flash-style KV blocking + online softmax.
    # TODO(synk): on v7x with B == 1 and multiple target tiles, pass
    # cache_kv=False so the t axis can be marked "parallel" for megacore use.

    # KV caching across t-tiles needs the t axis to run sequentially per core.
    if cache_kv and nt > 1:
        dim_sem = ("parallel", "arbitrary")
    else:
        dim_sem = ("parallel", "parallel")

    # Explicit VMEM budget: resident weight slabs (double-buffered), activation
    # tiles, K/V scratch, plus (bt, S) f32 softmax temporaries.
    itemsize = jnp.dtype(compute_dtype).itemsize
    est = (2 * bt * E * itemsize                    # q tile (x2 buffers)
           + 2 * S * E * itemsize                   # kv tile (x2 buffers)
           + 2 * bt * O * 4                         # out tile (x2 buffers)
           + 2 * (3 * E * E + E * O) * itemsize     # weight slabs (x2 buffers)
           + 2 * (E + O) * 4                        # biases
           + 2 * S * E * itemsize                   # K/V scratch
           + 6 * bt * max(S, E, O) * 4)             # score/exp/proj temporaries
    vmem_limit = int(min(max(int(est * 1.3), 32 * 1024 * 1024), 64 * 1024 * 1024))

    kernel = functools.partial(_attention_kernel, num_heads=H, head_dim=D,
                               cache_kv=cache_kv)

    out = pl.pallas_call(
        kernel,
        out_shape=jax.ShapeDtypeStruct((B, T, O), query_states.dtype),
        grid_spec=pltpu.PrefetchScalarGridSpec(
            num_scalar_prefetch=0,
            grid=(B, nt),
            in_specs=[
                pl.BlockSpec((1, bt, E), lambda b, t: (b, t, 0)),   # query tile
                pl.BlockSpec((1, S, E), lambda b, t: (b, 0, 0)),    # kv (full src)
                pl.BlockSpec((E, E), lambda b, t: (0, 0)),          # Wq (resident)
                pl.BlockSpec((1, E), lambda b, t: (0, 0)),          # bq
                pl.BlockSpec((E, E), lambda b, t: (0, 0)),          # Wk (resident)
                pl.BlockSpec((E, E), lambda b, t: (0, 0)),          # Wv (resident)
                pl.BlockSpec((E, O), lambda b, t: (0, 0)),          # Wo (resident)
                pl.BlockSpec((1, O), lambda b, t: (0, 0)),          # bo (folded)
            ],
            out_specs=pl.BlockSpec((1, bt, O), lambda b, t: (b, t, 0)),
            scratch_shapes=[pltpu.VMEM((S, E), compute_dtype),      # projected K
                            pltpu.VMEM((S, E), compute_dtype)],     # projected V
        ),
        compiler_params=pltpu.CompilerParams(
            dimension_semantics=dim_sem,
            vmem_limit_bytes=vmem_limit,
        ),
    )(q_in, kv_in, wq_r, bq_r, wk_r, wv_r, wo_r, bo_r)
    return out


# ----------------------------------------------------------------------------
# Pure-JAX f32 reference (mirrors the PyTorch eval-mode forward).
# ----------------------------------------------------------------------------
def _reference(query_states, kv_states, wq, bq, wkv, bkv, wo, bo, *, num_heads,
               out_seq_len=None):
    B, S, E = kv_states.shape
    H = num_heads
    D = E // H
    T = out_seq_len if out_seq_len is not None else S
    hp = jax.lax.Precision.HIGHEST
    kv = jnp.einsum("bse,oe->bso", kv_states, wkv, precision=hp) + bkv
    q = jnp.einsum("bte,oe->bto", query_states[:, :T], wq, precision=hp) + bq
    k, v = kv[..., :E], kv[..., E:]
    q = q.reshape(B, T, H, D).transpose(0, 2, 1, 3)
    k = k.reshape(B, S, H, D).transpose(0, 2, 1, 3)
    v = v.reshape(B, S, H, D).transpose(0, 2, 1, 3)
    s = jnp.einsum("bhtd,bhsd->bhts", q, k, precision=hp) / math.sqrt(D)
    p = jax.nn.softmax(s, axis=-1)
    x = jnp.einsum("bhts,bhsd->bhtd", p, v, precision=hp)
    x = x.transpose(0, 2, 1, 3).reshape(B, T, E)
    return jnp.einsum("bte,oe->bto", x, wo, precision=hp) + bo


if __name__ == "__main__":
    # Small shapes consistent with the module: hidden_size=128, heads=2
    # (head_dim=64), out_dim=128, seq=16, batch=2.
    B, S, E, NH, O = 2, 16, 128, 2, 128

    key = jax.random.PRNGKey(0)
    ks = jax.random.split(key, 8)
    query = jax.random.normal(ks[0], (B, S, E), dtype=jnp.float32)
    kv = jax.random.normal(ks[1], (B, S, E), dtype=jnp.float32)
    wq = jax.random.normal(ks[2], (E, E), dtype=jnp.float32) * 0.02
    bq = jax.random.normal(ks[3], (E,), dtype=jnp.float32) * 0.02
    wkv = jax.random.normal(ks[4], (2 * E, E), dtype=jnp.float32) * 0.02
    bkv = jax.random.normal(ks[5], (2 * E,), dtype=jnp.float32) * 0.02
    wo = jax.random.normal(ks[6], (O, E), dtype=jnp.float32) * 0.02
    bo = jax.random.normal(ks[7], (O,), dtype=jnp.float32) * 0.02

    out = fast_clip_attention2_forward(query, kv, wq, bq, wkv, bkv, wo, bo,
                                       num_heads=NH)
    out = jax.block_until_ready(out)

    ref = _reference(query, kv, wq, bq, wkv, bkv, wo, bo, num_heads=NH)
    assert out.shape == (B, S, O)
    max_err = float(jnp.max(jnp.abs(out - ref)))
    assert jnp.allclose(out, ref, atol=1e-2, rtol=1e-2), (
        f"mismatch vs reference (max |err| = {max_err})")

    print("KERNEL_OK")
</pallas_src>

<mosaic_0001>
module attributes {stable_mosaic.version = 11 : i64} {
  func.func @_attention_kernel(%arg0: i32, %arg1: i32, %arg2: memref<1x16x128xbf16, #tpu.memory_space<vmem>>, %arg3: memref<1x16x128xbf16, #tpu.memory_space<vmem>>, %arg4: memref<128x128xbf16, #tpu.memory_space<vmem>>, %arg5: memref<1x128xf32, #tpu.memory_space<vmem>>, %arg6: memref<128x128xbf16, #tpu.memory_space<vmem>>, %arg7: memref<128x128xbf16, #tpu.memory_space<vmem>>, %arg8: memref<128x128xbf16, #tpu.memory_space<vmem>>, %arg9: memref<1x128xf32, #tpu.memory_space<vmem>>, %arg10: memref<1x16x128xf32, #tpu.memory_space<vmem>>, %arg11: memref<16x128xbf16, #tpu.memory_space<vmem>>, %arg12: memref<16x128xbf16, #tpu.memory_space<vmem>>) attributes {dimension_semantics = [#tpu.dimension_semantics<parallel>, #tpu.dimension_semantics<parallel>], iteration_bounds = array<i64: 2, 1>, scalar_prefetch = 0 : i64, scratch_operands = 2 : i64, tpu.core_type = #tpu.core_type<tc>, window_params = [{transform_indices = @transform_0, window_bounds = array<i64: 1, 16, 128>}, {transform_indices = @transform_1, window_bounds = array<i64: 1, 16, 128>}, {pipeline_mode = #tpu.pipeline_mode<synchronous>, transform_indices = @transform_2, window_bounds = array<i64: 128, 128>}, {pipeline_mode = #tpu.pipeline_mode<synchronous>, transform_indices = @transform_3, window_bounds = array<i64: 1, 128>}, {pipeline_mode = #tpu.pipeline_mode<synchronous>, transform_indices = @transform_4, window_bounds = array<i64: 128, 128>}, {pipeline_mode = #tpu.pipeline_mode<synchronous>, transform_indices = @transform_5, window_bounds = array<i64: 128, 128>}, {pipeline_mode = #tpu.pipeline_mode<synchronous>, transform_indices = @transform_6, window_bounds = array<i64: 128, 128>}, {pipeline_mode = #tpu.pipeline_mode<synchronous>, transform_indices = @transform_7, window_bounds = array<i64: 1, 128>}, {transform_indices = @transform_8, window_bounds = array<i64: 1, 16, 128>}]} {
    %c0_i32 = arith.constant 0 : i32
    %0 = arith.cmpi eq, %arg1, %c0_i32 : i32
    %1 = arith.extui %0 : i1 to i32
    %c0_i32_0 = arith.constant 0 : i32
    %2 = arith.cmpi ne, %1, %c0_i32_0 : i32
    scf.if %2 {
      %c0_30 = arith.constant 0 : index
      %c0_31 = arith.constant 0 : index
      %c0_32 = arith.constant 0 : index
      %55 = vector.load %arg3[%c0_30, %c0_31, %c0_32] : memref<1x16x128xbf16, #tpu.memory_space<vmem>>, vector<1x16x128xbf16>
      %56 = vector.shape_cast %55 : vector<1x16x128xbf16> to vector<16x128xbf16>
      %c0_33 = arith.constant 0 : index
      %c0_34 = arith.constant 0 : index
      %57 = vector.load %arg6[%c0_33, %c0_34] : memref<128x128xbf16, #tpu.memory_space<vmem>>, vector<128x128xbf16>
      %cst_35 = arith.constant dense<0.000000e+00> : vector<16x128xf32>
      %58 = tpu.matmul %56, %57, %cst_35 {dimension_numbers = #tpu.dot_dimension_numbers<[1], [0], [0], [1], [0, 0, 1, 1], [], []>} : vector<16x128xbf16>, vector<128x128xbf16>, vector<16x128xf32> -> vector<16x128xf32>
      %59 = arith.truncf %58 : vector<16x128xf32> to vector<16x128xbf16>
      %c0_36 = arith.constant 0 : index
      %c0_37 = arith.constant 0 : index
      %60 = vector.load %arg11[%c0_36, %c0_37] : memref<16x128xbf16, #tpu.memory_space<vmem>>, vector<16x128xbf16>
      tpu.vector_store %arg11[%c0_36, %c0_37], %59 {strides = array<i32>} : memref<16x128xbf16, #tpu.memory_space<vmem>>, vector<16x128xbf16>,
      %c0_38 = arith.constant 0 : index
      %c0_39 = arith.constant 0 : index
      %61 = vector.load %arg7[%c0_38, %c0_39] : memref<128x128xbf16, #tpu.memory_space<vmem>>, vector<128x128xbf16>
      %cst_40 = arith.constant dense<0.000000e+00> : vector<16x128xf32>
      %62 = tpu.matmul %56, %61, %cst_40 {dimension_numbers = #tpu.dot_dimension_numbers<[1], [0], [0], [1], [0, 0, 1, 1], [], []>} : vector<16x128xbf16>, vector<128x128xbf16>, vector<16x128xf32> -> vector<16x128xf32>
      %63 = arith.truncf %62 : vector<16x128xf32> to vector<16x128xbf16>
      %c0_41 = arith.constant 0 : index
      %c0_42 = arith.constant 0 : index
      %64 = vector.load %arg12[%c0_41, %c0_42] : memref<16x128xbf16, #tpu.memory_space<vmem>>, vector<16x128xbf16>
      tpu.vector_store %arg12[%c0_41, %c0_42], %63 {strides = array<i32>} : memref<16x128xbf16, #tpu.memory_space<vmem>>, vector<16x128xbf16>,
    } else {
    }
    %c0 = arith.constant 0 : index
    %c0_1 = arith.constant 0 : index
    %c0_2 = arith.constant 0 : index
    %3 = vector.load %arg2[%c0, %c0_1, %c0_2] : memref<1x16x128xbf16, #tpu.memory_space<vmem>>, vector<1x16x128xbf16>
    %4 = vector.shape_cast %3 : vector<1x16x128xbf16> to vector<16x128xbf16>
    %c0_3 = arith.constant 0 : index
    %c0_4 = arith.constant 0 : index
    %5 = vector.load %arg4[%c0_3, %c0_4] : memref<128x128xbf16, #tpu.memory_space<vmem>>, vector<128x128xbf16>
    %cst = arith.constant dense<0.000000e+00> : vector<16x128xf32>
    %6 = tpu.matmul %4, %5, %cst {dimension_numbers = #tpu.dot_dimension_numbers<[1], [0], [0], [1], [0, 0, 1, 1], [], []>} : vector<16x128xbf16>, vector<128x128xbf16>, vector<16x128xf32> -> vector<16x128xf32>
    %c0_5 = arith.constant 0 : index
    %c0_6 = arith.constant 0 : index
    %7 = vector.load %arg5[%c0_5, %c0_6] : memref<1x128xf32, #tpu.memory_space<vmem>>, vector<1x128xf32>
    %8 = vector.broadcast %7 : vector<1x128xf32> to vector<16x128xf32>
    %9 = arith.addf %6, %8 : vector<16x128xf32>
    %10 = vector.extract_strided_slice %9 {offsets = [0, 0], sizes = [16, 64], strides = [1, 1]} : vector<16x128xf32> to vector<16x64xf32>
    %11 = arith.truncf %10 : vector<16x64xf32> to vector<16x64xbf16>
    %c0_7 = arith.constant 0 : index
    %c0_8 = arith.constant 0 : index
    %12 = vector.load %arg11[%c0_7, %c0_8] : memref<16x128xbf16, #tpu.memory_space<vmem>>, vector<16x64xbf16>
    %c0_9 = arith.constant 0 : index
    %c0_10 = arith.constant 0 : index
    %13 = vector.load %arg12[%c0_9, %c0_10] : memref<16x128xbf16, #tpu.memory_space<vmem>>, vector<16x64xbf16>
    "tpu.trace_start"() <{level = 10 : i32, message = "td,sd->ts"}> : () -> ()
    %cst_11 = arith.constant dense<0.000000e+00> : vector<16x16xf32>
    %14 = tpu.matmul %11, %12, %cst_11 {dimension_numbers = #tpu.dot_dimension_numbers<[1], [1], [0], [0], [0, 0, 1, 0], [], []>} : vector<16x64xbf16>, vector<16x64xbf16>, vector<16x16xf32> -> vector<16x16xf32>
    "tpu.trace_stop"() : () -> ()
    %cst_12 = arith.constant dense<0xFF800000> : vector<16xf32>
    %15 = vector.multi_reduction <maximumf>, %14, %cst_12 [1] : vector<16x16xf32> to vector<16xf32>
    %16 = vector.shape_cast %15 : vector<16xf32> to vector<16x1xf32>
    %17 = vector.broadcast %16 : vector<16x1xf32> to vector<16x16xf32>
    %18 = arith.subf %14, %17 : vector<16x16xf32>
    %19 = math.exp %18 : vector<16x16xf32>
    %cst_13 = arith.constant dense<0.000000e+00> : vector<16xf32>
    %20 = vector.multi_reduction <add>, %19, %cst_13 [1] : vector<16x16xf32> to vector<16xf32>
    %21 = vector.shape_cast %20 : vector<16xf32> to vector<16x1xf32>
    %22 = arith.truncf %19 : vector<16x16xf32> to vector<16x16xbf16>
    %cst_14 = arith.constant dense<0.000000e+00> : vector<16x64xf32>
    %23 = tpu.matmul %22, %13, %cst_14 {dimension_numbers = #tpu.dot_dimension_numbers<[1], [0], [0], [1], [0, 0, 1, 1], [], []>} : vector<16x16xbf16>, vector<16x64xbf16>, vector<16x64xf32> -> vector<16x64xf32>
    %24 = tpu.reciprocal %21 {approx = true} : vector<16x1xf32> -> vector<16x1xf32>
    %25 = vector.broadcast %24 : vector<16x1xf32> to vector<16x64xf32>
    %26 = arith.mulf %23, %25 : vector<16x64xf32>
    %27 = arith.truncf %26 : vector<16x64xf32> to vector<16x64xbf16>
    %28 = vector.extract_strided_slice %9 {offsets = [0, 64], sizes = [16, 64], strides = [1, 1]} : vector<16x128xf32> to vector<16x64xf32>
    %29 = arith.truncf %28 : vector<16x64xf32> to vector<16x64xbf16>
    %c0_15 = arith.constant 0 : index
    %c64 = arith.constant 64 : index
    %30 = vector.load %arg11[%c0_15, %c64] : memref<16x128xbf16, #tpu.memory_space<vmem>>, vector<16x64xbf16>
    %c0_16 = arith.constant 0 : index
    %c64_17 = arith.constant 64 : index
    %31 = vector.load %arg12[%c0_16, %c64_17] : memref<16x128xbf16, #tpu.memory_space<vmem>>, vector<16x64xbf16>
    "tpu.trace_start"() <{level = 10 : i32, message = "td,sd->ts"}> : () -> ()
    %cst_18 = arith.constant dense<0.000000e+00> : vector<16x16xf32>
    %32 = tpu.matmul %29, %30, %cst_18 {dimension_numbers = #tpu.dot_dimension_numbers<[1], [1], [0], [0], [0, 0, 1, 0], [], []>} : vector<16x64xbf16>, vector<16x64xbf16>, vector<16x16xf32> -> vector<16x16xf32>
    "tpu.trace_stop"() : () -> ()
    %cst_19 = arith.constant dense<0xFF800000> : vector<16xf32>
    %33 = vector.multi_reduction <maximumf>, %32, %cst_19 [1] : vector<16x16xf32> to vector<16xf32>
    %34 = vector.shape_cast %33 : vector<16xf32> to vector<16x1xf32>
    %35 = vector.broadcast %34 : vector<16x1xf32> to vector<16x16xf32>
    %36 = arith.subf %32, %35 : vector<16x16xf32>
    %37 = math.exp %36 : vector<16x16xf32>
    %cst_20 = arith.constant dense<0.000000e+00> : vector<16xf32>
    %38 = vector.multi_reduction <add>, %37, %cst_20 [1] : vector<16x16xf32> to vector<16xf32>
    %39 = vector.shape_cast %38 : vector<16xf32> to vector<16x1xf32>
    %40 = arith.truncf %37 : vector<16x16xf32> to vector<16x16xbf16>
    %cst_21 = arith.constant dense<0.000000e+00> : vector<16x64xf32>
    %41 = tpu.matmul %40, %31, %cst_21 {dimension_numbers = #tpu.dot_dimension_numbers<[1], [0], [0], [1], [0, 0, 1, 1], [], []>} : vector<16x16xbf16>, vector<16x64xbf16>, vector<16x64xf32> -> vector<16x64xf32>
    %42 = tpu.reciprocal %39 {approx = true} : vector<16x1xf32> -> vector<16x1xf32>
    %43 = vector.broadcast %42 : vector<16x1xf32> to vector<16x64xf32>
    %44 = arith.mulf %41, %43 : vector<16x64xf32>
    %45 = arith.truncf %44 : vector<16x64xf32> to vector<16x64xbf16>
    %46 = tpu.concatenate %27, %45 in 1 : vector<16x64xbf16>, vector<16x64xbf16> -> vector<16x128xbf16>
    %c0_22 = arith.constant 0 : index
    %c0_23 = arith.constant 0 : index
    %47 = vector.load %arg8[%c0_22, %c0_23] : memref<128x128xbf16, #tpu.memory_space<vmem>>, vector<128x128xbf16>
    %cst_24 = arith.constant dense<0.000000e+00> : vector<16x128xf32>
    %48 = tpu.matmul %46, %47, %cst_24 {dimension_numbers = #tpu.dot_dimension_numbers<[1], [0], [0], [1], [0, 0, 1, 1], [], []>} : vector<16x128xbf16>, vector<128x128xbf16>, vector<16x128xf32> -> vector<16x128xf32>
    %c0_25 = arith.constant 0 : index
    %c0_26 = arith.constant 0 : index
    %49 = vector.load %arg9[%c0_25, %c0_26] : memref<1x128xf32, #tpu.memory_space<vmem>>, vector<1x128xf32>
    %50 = vector.broadcast %49 : vector<1x128xf32> to vector<16x128xf32>
    %51 = arith.addf %48, %50 : vector<16x128xf32>
    %c0_27 = arith.constant 0 : index
    %c0_28 = arith.constant 0 : index
    %c0_29 = arith.constant 0 : index
    %52 = vector.load %arg10[%c0_27, %c0_28, %c0_29] : memref<1x16x128xf32, #tpu.memory_space<vmem>>, vector<1x16x128xf32>
    %53 = vector.shape_cast %52 : vector<1x16x128xf32> to vector<16x128xf32>
    %54 = vector.shape_cast %51 : vector<16x128xf32> to vector<1x16x128xf32>
    tpu.vector_store %arg10[%c0_27, %c0_28, %c0_29], %54 {strides = array<i32>} : memref<1x16x128xf32, #tpu.memory_space<vmem>>, vector<1x16x128xf32>,
    return
  }
  func.func @transform_0(%arg0: i32, %arg1: i32) -> (i32, i32, i32) {
    %c0_i32 = arith.constant 0 : i32
    %c0_i32_0 = arith.constant 0 : i32
    return %arg0, %arg1, %c0_i32 : i32, i32, i32
  }
  func.func @transform_1(%arg0: i32, %arg1: i32) -> (i32, i32, i32) {
    %c0_i32 = arith.constant 0 : i32
    %c0_i32_0 = arith.constant 0 : i32
    %c0_i32_1 = arith.constant 0 : i32
    return %arg0, %c0_i32, %c0_i32_0 : i32, i32, i32
  }
  func.func @transform_2(%arg0: i32, %arg1: i32) -> (i32, i32) {
    %c0_i32 = arith.constant 0 : i32
    %c0_i32_0 = arith.constant 0 : i32
    %c0_i32_1 = arith.constant 0 : i32
    return %c0_i32, %c0_i32_0 : i32, i32
  }
  func.func @transform_3(%arg0: i32, %arg1: i32) -> (i32, i32) {
    %c0_i32 = arith.constant 0 : i32
    %c0_i32_0 = arith.constant 0 : i32
    %c0_i32_1 = arith.constant 0 : i32
    return %c0_i32, %c0_i32_0 : i32, i32
  }
  func.func @transform_4(%arg0: i32, %arg1: i32) -> (i32, i32) {
    %c0_i32 = arith.constant 0 : i32
    %c0_i32_0 = arith.constant 0 : i32
    %c0_i32_1 = arith.constant 0 : i32
    return %c0_i32, %c0_i32_0 : i32, i32
  }
  func.func @transform_5(%arg0: i32, %arg1: i32) -> (i32, i32) {
    %c0_i32 = arith.constant 0 : i32
    %c0_i32_0 = arith.constant 0 : i32
    %c0_i32_1 = arith.constant 0 : i32
    return %c0_i32, %c0_i32_0 : i32, i32
  }
  func.func @transform_6(%arg0: i32, %arg1: i32) -> (i32, i32) {
    %c0_i32 = arith.constant 0 : i32
    %c0_i32_0 = arith.constant 0 : i32
    %c0_i32_1 = arith.constant 0 : i32
    return %c0_i32, %c0_i32_0 : i32, i32
  }
  func.func @transform_7(%arg0: i32, %arg1: i32) -> (i32, i32) {
    %c0_i32 = arith.constant 0 : i32
    %c0_i32_0 = arith.constant 0 : i32
    %c0_i32_1 = arith.constant 0 : i32
    return %c0_i32, %c0_i32_0 : i32, i32
  }
  func.func @transform_8(%arg0: i32, %arg1: i32) -> (i32, i32, i32) {
    %c0_i32 = arith.constant 0 : i32
    %c0_i32_0 = arith.constant 0 : i32
    return %arg0, %arg1, %c0_i32 : i32, i32, i32
  }
}

</mosaic_0001>

<bundles_post_ra>
// kernel: tpu_custom_call.1
= control target key start
LH: loop header
LB: loop body
LE: loop exit
PB: predicated region body
PF: predicated region fallthrough
CT: control target
= control target key end

     0   :  { %s2426_s0 = inlined_call_operand.hbm [shape: bf16[2,16,128], index: 0, kind: input, shape index: {}]   ;;  %s2427_s1 = inlined_call_operand.hbm [shape: bf16[2,16,128], index: 1, kind: input, shape index: {}]   ;;  %s2428_s2 = inlined_call_operand.hbm [shape: bf16[128,128], index: 2, kind: input, shape index: {}]   ;;  %s2429_s3 = inlined_call_operand.vmem [shape: f32[1,128], index: 3, kind: input, shape index: {}]   ;;  %s2430_s4 = inlined_call_operand.hbm [shape: bf16[128,128], index: 4, kind: input, shape index: {}]   ;;  %s2431_s5 = inlined_call_operand.hbm [shape: bf16[128,128], index: 5, kind: input, shape index: {}]   ;;  %s2432_s6 = inlined_call_operand.hbm [shape: bf16[128,128], index: 6, kind: input, shape index: {}]   ;;  %s2433_s7 = inlined_call_operand.vmem [shape: f32[1,128], index: 7, kind: input, shape index: {}]   ;;  %s2434_s8 = inlined_call_operand.hbm [shape: f32[2,16,128], index: 8, kind: output, shape index: {}]  }
   0x1   :  { %2441 = sst [smem:[#allocation23_spill]] %s2426_s0 }
   0x2   :  { %2442 = sst [smem:[#allocation24_spill]] %s2427_s1 }
   0x3   :  { %2443 = sst [smem:[#allocation25_spill]] %s2428_s2 }
   0x4   :  { %2444 = sst [smem:[#allocation26_spill]] %s2430_s4 }
   0x5   :  { %2445 = sst [smem:[#allocation27_spill]] %s2431_s5 }
   0x6   :  { %2446 = sst [smem:[#allocation28_spill]] %s2432_s6 }
   0x7   :  { %13 = vsyncpa [#allocation5], 0 }
   0x8   :  { %15 = vsyncpa [#allocation5 + $0x1], 0 }
   0x9   :  { %16 = vsyncpa [#allocation8], 0 }
   0xa   :  { %18 = vsyncpa [#allocation8 + $0x1], 0 }
   0xb   :  { %19 = vsyncpa [#allocation11], 0 }
   0xc   :  { %20 = vsyncpa [#allocation14], 0 }
   0xd   :  { %21 = vsyncpa [#allocation6], 0 }
   0xe   :  { %23 = vsyncpa [#allocation6 + $0x1], 0  ;;  %s2086_s27 = smov 0   ;;  %s2088_s28 = smov 0  }
   0xf   :  { %s2090_s29 = smov 0   ;;  %s2092_s30 = smov 0  }
  0x10   :  { %s2094_s9 = smov 0   ;;  %s2096_s10 = smov 0  }
  0x11 LB: > { %s2117_s11 = sadd.s32 4294967295, %s2025_s10   ;;  %s1361_s12 = sadd.s32 4294967294, %s2025_s10   ;;  %s2025_s10 = sphi %s2096_s10, %s29_s10   ;;  %s2021_s9 = sphi %s2094_s9, %s2474_s9   ;;  %s2017_s30 = sphi %s2092_s30, %s2473_s30   ;;  %s2013_s29 = sphi %s2090_s29, %s2472_s29   ;;  %s2009_s28 = sphi %s2088_s28, %s2471_s28   ;;  %s2005_s27 = sphi %s2086_s27, %s2470_s27  }
  0x12   : > { %p63_p0 = scmp.ne.s32.totalorder %s2009_s28, %s2005_s27  ;;  %p2435_p1 = scmp.eq.s32.totalorder %s2117_s11, 0 }
  0x13   : > { %p241_p2 = scmp.eq.s32.totalorder %s2117_s11, 1  ;;  %p247_p3 = scmp.eq.s32.totalorder %s1361_s12, 1 }
  0x14   : > { %p2126_p4 = por %p2435_p1, %p63_p0  ;;  %p1362_p5 = scmp.ge.s32.totalorder %s2025_s10, 1 }
  0x15   : > { %p2131_p6 = por %p247_p3, %p63_p0  ;;  %p254_p7 = scmp.lt.s32.totalorder %s2025_s10, 3 }
  0x16   : > { %s2027_s16 = smov [#allocation9]   ;;  %s2028_s19 = smov [#allocation10]  }
  0x17   : > { %p2136_p8 = pnand %p1362_p5, %p254_p7  ;;  %s266_s17 = sshll.u32 %s2027_s16, 4  ;;  %s267_s17 = int_to_ptr.vmem [resolvable:$true] %s266_s17 }
  0x18   : > { %s282_s20 = sshll.u32 %s2028_s19, 4  ;;  %s2029_s21 = smov [#allocation12]   ;;  %s283_s20 = int_to_ptr.vmem [resolvable:$true] %s282_s20 }
  0x19   : > { %p1622_p9 = pneg %p2136_p8  ;;  %s295_s22 = sshll.u32 %s2029_s21, 4  ;;  %s296_s22 = int_to_ptr.vmem [resolvable:$true] %s295_s22 }
  0x1a   : > { %s1780_s23 = scalar_lea.vmem %s267_s17, 1024  ;;  %p1788_p5 = scmp.lt.s32.totalorder %s267_s17, %s267_s17 }
  0x1b   : > { %p2145_p11 = pnand %p1622_p9, %p2435_p1  ;;  %p1781_p13 = scmp.ne.s32.totalorder %s267_s17, %s1780_s23 }
  0x1c   : > { %p1789_p7 = scmp.lt.s32.totalorder %s1780_s23, %s1780_s23 }
  0x1d   : > { %p1771_p12 = pneg %p2145_p11 }
  0x1e   : > { %p1790_p9 = por %p1789_p7, %p1788_p5 }
  0x1f   : > { %p1783_p0 = pnand %p1781_p13, %p1771_p12 }
  0x21   : > { %p1784_p3 = pneg %p1783_p0 }
  0x23   : > { %p1791_p10 = pnand %p1790_p9, %p1784_p3 }
  0x25   : > { %1794 = shalt.err (!%p1791_p10)
}
  0x26   : > { %s2436_s24 = smov 64   ;;  %s2438_s25 = smov 4  }
  0x27   : > { %s2451_s2 = sld [smem:[#allocation25_spill]]  ;;  %s1806_s16 = scalar_lea.vmem %s283_s20, 1024 }
  0x28   : > { %p1807_p13 = scmp.ne.s32.totalorder %s283_s20, %s1806_s16  ;;  %p1814_p3 = scmp.lt.s32.totalorder %s283_s20, %s283_s20 }
  0x29   : > { %p1815_p10 = scmp.lt.s32.totalorder %s1806_s16, %s1806_s16 }
  0x2a   : > { %p1809_p0 = pnand %p1807_p13, %p1771_p12 }
  0x2b   : > { %p1816_p7 = por %p1815_p10, %p1814_p3 }
  0x2c   : > { %p1810_p5 = pneg %p1809_p0 }
  0x2d   : > { %1625 = dma.hbm_to_vmem [thread:$0]  (!%p2145_p11), %s2451_s2, 1024, %s267_s17, [#allocation8], %s2436_s24, %s2436_s24, %s2438_s25  }
  0x2e   : > { %p1817_p9 = pnand %p1816_p7, %p1810_p5 }
  0x30   : > { %1820 = shalt.err (!%p1817_p9)
}
  0x31   : > { %s2452_s4 = sld [smem:[#allocation26_spill]]  ;;  %s1832_s17 = scalar_lea.vmem %s296_s22, 1024 }
  0x32   : > { %p1833_p1 = scmp.ne.s32.totalorder %s296_s22, %s1832_s17  ;;  %p1840_p3 = scmp.lt.s32.totalorder %s296_s22, %s296_s22 }
  0x33   : > { %p1841_p5 = scmp.lt.s32.totalorder %s1832_s17, %s1832_s17 }
  0x34   : > { %p1835_p13 = pnand %p1833_p1, %p1771_p12 }
  0x35   : > { %p1842_p10 = por %p1841_p5, %p1840_p3 }
  0x36   : > { %p1836_p0 = pneg %p1835_p13 }
  0x37   : > { %1628 = dma.hbm_to_vmem [thread:$0]  (!%p2145_p11), %s2452_s4, 1024, %s283_s20, [#allocation11], %s2436_s24, %s2436_s24, %s2438_s25  }
  0x38   : > { %p1843_p7 = pnand %p1842_p10, %p1836_p0 }
  0x3a   : > { %1846 = shalt.err (!%p1843_p7)
}
  0x3b   : > { %s2453_s5 = sld [smem:[#allocation27_spill]]  ;;  %s2032_s20 = smov [#allocation13]  }
  0x3c   : > { %s308_s12 = sshll.u32 %s2032_s20, 4  ;;  %s309_s12 = int_to_ptr.vmem [resolvable:$true] %s308_s12 }
  0x3d   : > { %s1858_s16 = scalar_lea.vmem %s309_s12, 1024  ;;  %p1866_p0 = scmp.lt.s32.totalorder %s309_s12, %s309_s12 }
  0x3e   : > { %p1859_p1 = scmp.ne.s32.totalorder %s309_s12, %s1858_s16  ;;  %p1867_p3 = scmp.lt.s32.totalorder %s1858_s16, %s1858_s16 }
  0x40   : > { %p1861_p9 = pnand %p1859_p1, %p1771_p12  ;;  %p1868_p5 = por %p1867_p3, %p1866_p0 }
  0x41   : > { %1631 = dma.hbm_to_vmem [thread:$0]  (!%p2145_p11), %s2453_s5, 1024, %s296_s22, [#allocation11], %s2436_s24, %s2436_s24, %s2438_s25  }
  0x42   : > { %p1862_p13 = pneg %p1861_p9 }
  0x44   : > { %p1869_p10 = pnand %p1868_p5, %p1862_p13 }
  0x46   : > { %1872 = shalt.err (!%p1869_p10)
}
  0x47   : > { %s2454_s6 = sld [smem:[#allocation28_spill]]  ;;  %s41_s21 = sadd.s32 1, %s2021_s9 }
  0x48   : > { %s50_s18 = sadd.s32 1, %s2013_s29  ;;  %p43_p12 = scmp.ge.s32.totalorder %s41_s21, 2 }
  0x49   : > { %p57_p7 = scmp.ne.s32.totalorder %s2013_s29, %s2009_s28  ;;  %p58_p1 = scmp.eq.s32.totalorder %s2025_s10, 0 }
  0x4a   : > { %p1650_p9 = scmp.lt.s32.totalorder %s2025_s10, 2  ;;  %s2476_s21 = smov (%p43_p12, %s41_s21), 0 }
  0x4b   : > { %2455 = sst [smem:[#allocation22_spill]] %s2476_s21  ;;  %p59_p13 = por %p58_p1, %p57_p7 }
  0x4c   : > { %p2205_p0 = por %p241_p2, %p57_p7  ;;  %s45_s23 = ssub.s32 %s2021_s9, %s2476_s21 }
  0x4d   : > { %1634 = dma.hbm_to_vmem [thread:$0]  (!%p2145_p11), %s2454_s6, 1024, %s309_s12, [#allocation14], %s2436_s24, %s2436_s24, %s2438_s25  }
  0x4e   : > { %s325_s26 = sand.u32 1, %s2013_s29   ;;  %p48_p3 = scmp.eq.s32.totalorder %s45_s23, 0 }
  0x4f   : > { %s2212_s20 = sshll.u32 %s325_s26, 3  ;;  %s1435_s12 = sshll.u32 %s2021_s9, 7 }
  0x50   : > { %s2216_s16 = scalar_select %p48_p3, %s2013_s29, %s50_s18  }
  0x51   : > { %s2457_s0 = sld [smem:[#allocation23_spill]]  ;;  %s329_s25 = scalar_lea.vmem [#allocation4], %s2212_s20 }
  0x52   : > { %s338_s2 = sshll.u32 %s329_s25, 4  ;;  %p2224_p2 = pnand %p1650_p9, %p59_p13  ;;  %s339_s2 = int_to_ptr.vmem [resolvable:$true] %s338_s2 }
  0x53   : > { %s2459_s1 = sld [smem:[#allocation24_spill]]  ;;  %s326_s18 = scalar_lea.sflag [#allocation5], %s325_s26 }
  0x54   : > { %p1875_p11 = pneg %p2224_p2  ;;  %s1886_s22 = scalar_lea.vmem %s339_s2, 128 }
  0x55   : > { %p1887_p5 = scmp.ne.s32.totalorder %s339_s2, %s1886_s22  ;;  %s2033_s25 = smov [#allocation4]  }
  0x56   : > { %s1891_s19 = sshll.u32 %s2033_s25, 4  ;;  %s1892_s19 = int_to_ptr.vmem [resolvable:$false] %s1891_s19 }
  0x57   : > { %s337_s24 = scalar_lea.hbm %s2457_s0, %s1435_s12  ;;  %p1889_p10 = pnand %p1887_p5, %p1875_p11 }
  0x58   : > { %s1893_s0 = scalar_lea.vmem %s1892_s19, 256  ;;  %p1894_p7 = scmp.lt.s32.totalorder %s339_s2, %s1892_s19 }
  0x59   : > { %s2231_s6 = scalar_lea.hbm %s2459_s1, %s1435_s12  ;;  %p1890_p12 = pneg %p1889_p10 }
  0x5a   : > { %p1895_p1 = scmp.lt.s32.totalorder %s1893_s0, %s1886_s22 }
  0x5c   : > { %p1896_p9 = por %p1895_p1, %p1894_p7 }
  0x5e   : > { %p1897_p13 = pnand %p1896_p9, %p1890_p12 }
  0x60   : > { %1900 = shalt.err (!%p1897_p13)
}
  0x61   : > { %s2460_s5 = smov 4   ;;  %s2461_s26 = smov 64  }
  0x62   : > { %1638 = dma.hbm_to_vmem [thread:$0]  (!%p2224_p2), %s337_s24, 128, %s339_s2, %s326_s18, %s2461_s26, %s2461_s26, %s2460_s5  }
  0x63   : > { %s352_s12 = scalar_lea.vmem [#allocation7], %s2212_s20  ;;  %s348_s1 = sand.u32 1, %s2025_s10  }
  0x64   : > { %s359_s23 = sshll.u32 %s352_s12, 4  ;;  %s349_s25 = scalar_lea.sflag [#allocation8], %s348_s1  ;;  %s360_s23 = int_to_ptr.vmem [resolvable:$true] %s359_s23 }
  0x65   : > { %s1914_s21 = scalar_lea.vmem %s360_s23, 128  ;;  %s2034_s0 = smov [#allocation7]  }
  0x66   : > { %p1915_p3 = scmp.ne.s32.totalorder %s360_s23, %s1914_s21  ;;  %s1919_s22 = sshll.u32 %s2034_s0, 4  ;;  %s1920_s22 = int_to_ptr.vmem [resolvable:$false] %s1919_s22 }
  0x67   : > { %s1921_s19 = scalar_lea.vmem %s1920_s22, 256  ;;  %p1922_p12 = scmp.lt.s32.totalorder %s360_s23, %s1920_s22 }
  0x68   : > { %p1917_p5 = pnand %p1915_p3, %p1875_p11  ;;  %p1923_p7 = scmp.lt.s32.totalorder %s1921_s19, %s1914_s21 }
  0x6a   : > { %p1918_p10 = pneg %p1917_p5  ;;  %p1924_p1 = por %p1923_p7, %p1922_p12 }
  0x6c   : > { %p1925_p9 = pnand %p1924_p1, %p1918_p10 }
  0x6e   : > { %1928 = shalt.err (!%p1925_p9)
}
  0x6f   : > { %1641 = dma.hbm_to_vmem [thread:$0]  (!%p2224_p2), %s2231_s6, 128, %s360_s23, %s349_s25, %s2461_s26, %s2461_s26, %s2460_s5  }
  0x70   : > { %371 = sbr.rel (%p2136_p8) target bundleno = 1648 (0x670), region = 52  ;;  %s2257_s1 = sand.u32 (!%p2136_p8), 1, %s2009_s28  }
  0x71   : > { %s1375_s2 = sshll.u32 (!%p2136_p8), %s2257_s1, 3  ;;  %s374_s24 = scalar_lea.sflag (!%p2136_p8), [#allocation5], %s2257_s1 }
  0x72   : > { %s2261_s21 = scalar_lea.vmem (!%p2136_p8), [#allocation4], %s1375_s2 }
  0x75   : > { %1980 = dma.done.wait (%p2126_p4), %s374_s24, 128  }
  0x76   : > { %1982 = vsyncadd (%p2126_p4), %s374_s24, 4294967168  ;;  %s382_s4 = sand.u32 1, %s2117_s11   ;;  %s2268_s15 = scalar_lea.vmem [#allocation7], %s1375_s2 }
  0x77   : > { %s383_s6 = scalar_lea.sflag [#allocation8], %s382_s4 }
  0x78   : > { %1984 = dma.done.wait (%p2126_p4), %s383_s6, 128  }
  0x79   : > { %1986 = vsyncadd (%p2126_p4), %s383_s6, 4294967168  ;;  %p2462_p8 = scmp.eq.s32.totalorder %s2117_s11, 0 }
  0x7b   : > { %1988 = dma.done.wait (%p2462_p8), [#allocation8], 1024   ;;  %p2463_p2 = pmov %p2462_p8 }
  0x7d   : > { %1990 = vsyncadd (%p2463_p2), [#allocation8], 4294966272  ;;  %p2464_p11 = pmov %p2463_p2 }
  0x7e   : > { %p2465_p13 = pmov %p2463_p2 }
  0x7f   : > { %1992 = dma.done.wait (%p2464_p11), [#allocation11], 2048  }
  0x80   : > { %1994 = vsyncadd (%p2465_p13), [#allocation11], 4294965248  ;;  %p2466_p3 = pmov %p2463_p2 }
  0x81   : > { %p2467_p5 = pmov %p2463_p2 }
  0x82   : > { %1996 = dma.done.wait (%p2466_p3), [#allocation14], 1024  }
  0x83   : > { %1998 = vsyncadd (%p2467_p5), [#allocation14], 4294966272  ;;  %v2035_v0 = vmov 0.0   ;;  %vm2036_vm0 = vmmov 0   ;;  %v1715_v1 = vld [vmem:[#allocation10 + $0x38] sm:$0xff]   ;;  %v1716_v2 = vld [vmem:[#allocation10 + $0x30] sm:$0xff]  }
  0x84   : > { %1496 = vmatprep.subr.bf16.mxu0 %v2035_v0  ;;  %1512 = vmatprep.mubr.msk.bf16.mxu0 %vm2036_vm0, %v2035_v0  ;;  %v1717_v3 = vld [vmem:[#allocation10 + $0x28] sm:$0xff]   ;;  %v1718_v4 = vld [vmem:[#allocation10 + $0x20] sm:$0xff]   ;;  %v1719_v5 = vld [vmem:[#allocation10 + $0x18] sm:$0xff]   ;;  %vm815_vm1 = vcmask 523264   ;;  %s2037_s11 = smov 64   ;;  %vm863_vm2 = vcmask 130048  }
  0x85   : > { %1516 = vmatprep.subr.bf16.mxu1 %v2035_v0  ;;  %1532 = vmatprep.mubr.msk.bf16.mxu1 %vm2036_vm0, %v2035_v0  ;;  %v1720_v6 = vld [vmem:[#allocation10 + $0x10] sm:$0xff]   ;;  %v1733_v7 = vld [vmem:[#allocation12 + $0x38] sm:$0xff]   ;;  %v1721_v9 = vld [vmem:[#allocation10 + $0x8] sm:$0xff]   ;;  %s1381_s18 = sshll.u32 %s2257_s1, 4  ;;  %s1441_s25 = sshll.u32 %s2017_s30, 8 }
  0x86   : > { %1497 = vmatpush3.bf16.msra.mxu0 %v1715_v1  ;;  %1517 = vmatpush3.bf16.msra.mxu1 %v1733_v7  ;;  %v1734_v8 = vld [vmem:[#allocation12 + $0x30] sm:$0xff]   ;;  %v1735_v10 = vld [vmem:[#allocation12 + $0x28] sm:$0xff]   ;;  %v1722_v11 = vld [vmem:[#allocation10] sm:$0xff]   ;;  %s439_s12 = scalar_lea.vmem [#allocation15], %s1381_s18  ;;  %s2378_s19 = scalar_lea.hbm %s2434_s8, %s1441_s25 }
  0x87   : > { %1498 = vmatprep.subr.bf16.mxu0 %v2035_v0  ;;  %1518 = vmatprep.subr.bf16.mxu1 %v2035_v0  ;;  %v1736_v12 = vld [vmem:[#allocation12 + $0x20] sm:$0xff]   ;;  %v1723_v13 = vld [vmem:[%s2268_s15] sm:$0xff]   ;;  %v1726_v16 = vld [vmem:[#allocation9 + $0x28] sm:$0xff]   ;;  %s1212_s23 = sshll.u32 %s439_s12, 4  ;;  %s1197_s2 = scalar_lea.sflag [#allocation6], %s2257_s1  ;;  %s2373_s23 = int_to_ptr.vmem [resolvable:$true] %s1212_s23 }
  0x88   : > { %v1724_v14 = vld [vmem:[#allocation9 + $0x38] sm:$0xff]   ;;  %v1725_v15 = vld [vmem:[#allocation9 + $0x30] sm:$0xff]   ;;  %v1727_v17 = vld [vmem:[#allocation9 + $0x20] sm:$0xff]   ;;  %s1929_s24 = scalar_lea.vmem %s2373_s23, 256  ;;  %s2038_s30 = smov [#allocation15]  }
  0x89   : > { %v1728_v18 = vld [vmem:[#allocation9 + $0x18] sm:$0xff]   ;;  %v1729_v19 = vld [vmem:[#allocation9 + $0x10] sm:$0xff]   ;;  %v1730_v20 = vld [vmem:[#allocation9 + $0x8] sm:$0xff]   ;;  %p1930_p4 = scmp.ne.s32.totalorder %s2373_s23, %s1929_s24 }
  0x8a   : > { %1499 = vmatpush3.bf16.msra.mxu0 %v1716_v2  ;;  %1519 = vmatpush3.bf16.msra.mxu1 %v1734_v8  ;;  %v1731_v21 = vld [vmem:[#allocation9] sm:$0xff]   ;;  %v1737_v23 = vld [vmem:[#allocation12 + $0x18] sm:$0xff]   ;;  %v1738_v24 = vld [vmem:[#allocation12 + $0x10] sm:$0xff]  }
  0x8b   : > { %1500 = vmatprep.subr.bf16.mxu0 %v2035_v0  ;;  %1520 = vmatprep.subr.bf16.mxu1 %v2035_v0  ;;  %v1732_v22 = vld [vmem:[%s2261_s21] sm:$0xff]   ;;  %v1403_v36 = vld [vmem:[%s2429_s3] ss:$0 sm:$0xff]  ;;  %p1931_p10 = pnand %p1930_p4, %p2205_p0  ;;  %s1933_s21 = sshll.u32 %s2038_s30, 4  ;;  %s1934_s21 = int_to_ptr.vmem [resolvable:$false] %s1933_s21 }
  0x8c   : > { %v1739_v25 = vld [vmem:[#allocation12 + $0x8] sm:$0xff]   ;;  %v1740_v26 = vld [vmem:[#allocation12] sm:$0xff]   ;;  %s1935_s4 = scalar_lea.vmem %s1934_s21, 512  ;;  %p1936_p7 = scmp.lt.s32.totalorder %s2373_s23, %s1934_s21 }
  0x8d   : > { %p1932_p12 = pneg %p1931_p10  ;;  %p1937_p1 = scmp.lt.s32.totalorder %s1935_s4, %s1929_s24 }
  0x8e   : > { %1501 = vmatpush3.bf16.msra.mxu0 %v1717_v3  ;;  %1521 = vmatpush3.bf16.msra.mxu1 %v1735_v10 }
  0x8f   : > { %1502 = vmatprep.subr.bf16.mxu0 %v2035_v0  ;;  %1522 = vmatprep.subr.bf16.mxu1 %v2035_v0  ;;  %p1938_p9 = por %p1937_p1, %p1936_p7 }
  0x91   : > { %p1939_p8 = pnand %p1938_p9, %p1932_p12 }
  0x92   : > { %1503 = vmatpush3.bf16.msra.mxu0 %v1718_v4  ;;  %1523 = vmatpush3.bf16.msra.mxu1 %v1736_v12 }
  0x93   : > { %1504 = vmatprep.subr.bf16.mxu0 %v2035_v0  ;;  %1524 = vmatprep.subr.bf16.mxu1 %v2035_v0 }
  0x96   : > { %1505 = vmatpush3.bf16.msra.mxu0 %v1719_v5  ;;  %1525 = vmatpush3.bf16.msra.mxu1 %v1737_v23 }
  0x97   : > { %1506 = vmatprep.subr.bf16.mxu0 %v2035_v0  ;;  %1526 = vmatprep.subr.bf16.mxu1 %v2035_v0 }
  0x9a   : > { %1507 = vmatpush3.bf16.msra.mxu0 %v1720_v6  ;;  %1527 = vmatpush3.bf16.msra.mxu1 %v1738_v24 }
  0x9b   : > { %1508 = vmatprep.subr.bf16.mxu0 %v2035_v0  ;;  %1528 = vmatprep.subr.bf16.mxu1 %v2035_v0 }
  0x9e   : > { %1509 = vmatpush3.bf16.msra.mxu0 %v1721_v9  ;;  %1529 = vmatpush3.bf16.msra.mxu1 %v1739_v25 }
  0x9f   : > { %1510 = vmatprep.subr.bf16.mxu0 %v2035_v0  ;;  %1530 = vmatprep.subr.bf16.mxu1 %v2035_v0 }
  0xa2   : > { %1511 = vmatpush3.bf16.msra.mxu0 %v1722_v11  ;;  %1531 = vmatpush3.bf16.msra.mxu1 %v1740_v26 }
  0xa3   : > { %1536 = vmatprep.subr.bf16.mxu0 %v2035_v0  ;;  %1556 = vmatprep.subr.bf16.mxu1 %v2035_v0 }
  0xa5   : > { %1513 = vmatmul.mubr.bf16.vlgmr.msra.gmra.mxu0 %v1723_v13  ;;  %1533 = vmatmul.mubr.bf16.vlgmr.msra.gmra.mxu1 %v1723_v13 }
  0xa6   : > { %1537 = vmatpush3.bf16.msra.mxu0 %v1724_v14  ;;  %1552 = vmatprep.mubr.msk.bf16.mxu0 %vm2036_vm0, %v2035_v0 }
  0xa7   : > { %1538 = vmatprep.subr.bf16.mxu0 %v2035_v0  ;;  %1558 = vmatprep.mubr.msk.bf16.mxu1 %vm2036_vm0, %v2035_v0 }
  0xaa   : > { %1539 = vmatpush3.bf16.msra.mxu0 %v1725_v15 }
  0xab   : > { %1540 = vmatprep.subr.bf16.mxu0 %v2035_v0 }
  0xae   : > { %1541 = vmatpush3.bf16.msra.mxu0 %v1726_v16 }
  0xaf   : > { %1542 = vmatprep.subr.bf16.mxu0 %v2035_v0 }
  0xb2   : > { %1543 = vmatpush3.bf16.msra.mxu0 %v1727_v17 }
  0xb3   : > { %1544 = vmatprep.subr.bf16.mxu0 %v2035_v0 }
  0xb6   : > { %1545 = vmatpush3.bf16.msra.mxu0 %v1728_v18 }
  0xb7   : > { %1546 = vmatprep.subr.bf16.mxu0 %v2035_v0 }
  0xba   : > { %1547 = vmatpush3.bf16.msra.mxu0 %v1729_v19 }
  0xbb   : > { %1548 = vmatprep.subr.bf16.mxu0 %v2035_v0 }
  0xbe   : > { %1549 = vmatpush3.bf16.msra.mxu0 %v1730_v20 }
  0xbf   : > { %1550 = vmatprep.subr.bf16.mxu0 %v2035_v0 }
  0xc2   : > { %1551 = vmatpush3.bf16.msra.mxu0 %v1731_v21 }
  0xc3   : > { %1580 = vmatprep.subr.bf16.mxu0 %v2035_v0 }
  0xc5   : > { %1553 = vmatmul.mubr.bf16.vlgmr.msra.gmra.mxu0 %v1732_v22 }
  0xc6   : > { %1596 = vmatprep.mubr.msk.bf16.mxu0 %vm2036_vm0, %v2035_v0 }
 0x165   : > { %v553_v27 = vpop.f32.mrf.mxu0  ;;  %v668_v43 = vpop.f32.mrf.mxu1 }
 0x167   : > { %v1514_v28 = vpop.f32.mrf.mxu0  ;;  %v1534_v44 = vpop.f32.mrf.mxu1 }
 0x169   : > { %v556_v29 = vpop.f32.mrf.mxu0  ;;  %v671_v45 = vpop.f32.mrf.mxu1 }
 0x16a   : > { %v1445_v30 = vpack.c.bf16 %v556_v29, %v553_v27  ;;  %v1450_v46 = vpack.c.bf16 %v671_v45, %v668_v43  ;;  %v1745_v29 = vld [vmem:[#allocation13 + $0x38] sm:$0xff]  }
 0x16b   : > { %v1515_v31 = vpop.f32.mrf.mxu0  ;;  %v1535_v47 = vpop.f32.mrf.mxu1  ;;  %1581 = vmatpush3.bf16.msra.mxu0 %v1745_v29 }
 0x16c   : > { %1446 = vst [vmem:[#allocation2] sm:$0xff] %v1445_v30   ;;  %1451 = vst [vmem:[#allocation3] sm:$0xff] %v1450_v46   ;;  %v1746_v30 = vld [vmem:[#allocation13 + $0x30] sm:$0xff]   ;;  %1582 = vmatprep.subr.bf16.mxu0 %v2035_v0  ;;  %v1747_v31 = vld [vmem:[#allocation13 + $0x28] sm:$0xff]  }
 0x16f   : > { %1583 = vmatpush3.bf16.msra.mxu0 %v1746_v30 }
 0x170   : > { %1584 = vmatprep.subr.bf16.mxu0 %v2035_v0 }
 0x173   : > { %v1741_v32 = vld [vmem:[#allocation2] sm:$0xff]   ;;  %v1743_v48 = vld [vmem:[#allocation3] sm:$0xff]   ;;  %1585 = vmatpush3.bf16.msra.mxu0 %v1747_v31 }
 0x174   : > { %v1742_v33 = vld [vmem:[#allocation2] sm:$0xff]   ;;  %950 = vrot.lane.b32.xlu1 %v1741_v32, %s2037_s11  ;;  %v1744_v14 = vld [vmem:[#allocation3] sm:$0xff]   ;;  %v1748_v32 = vld [vmem:[#allocation13 + $0x20] sm:$0xff]   ;;  %1586 = vmatprep.subr.bf16.mxu0 %v2035_v0 }
 0x175   : > { %v820_v34 = vsel %vm815_vm1, %v1742_v33, 0  ;;  %v1749_v33 = vld [vmem:[#allocation13 + $0x18] sm:$0xff]  }
 0x176   : > { %1557 = vmatpush3.bf16.xpose.msra.mxu1 %v820_v34  ;;  %v1750_v34 = vld [vmem:[#allocation13 + $0x10] sm:$0xff]  }
 0x177   : > { %1562 = vmatprep.subr.bf16.mxu1 %v2035_v0  ;;  %1587 = vmatpush3.bf16.msra.mxu0 %v1748_v32 }
 0x178   : > { %1588 = vmatprep.subr.bf16.mxu0 %v2035_v0 }
 0x17b   : > { %1589 = vmatpush3.bf16.msra.mxu0 %v1749_v33 }
 0x17c   : > { %1590 = vmatprep.subr.bf16.mxu0 %v2035_v0 }
 0x17f   : > { %1591 = vmatpush3.bf16.msra.mxu0 %v1750_v34 }
 0x180   : > { %1592 = vmatprep.subr.bf16.mxu0 %v2035_v0 }
 0x185   : > { %v798_v35 = vpop.f32.mrf.mxu0 }
 0x186   : > { %v799_v39 = vadd.f32 %v1403_v36, %v798_v35  ;;  %v1751_v35 = vld [vmem:[#allocation13 + $0x8] sm:$0xff]  }
 0x187   : > { %v1554_v37 = vpop.f32.mrf.mxu0  ;;  %1593 = vmatpush3.bf16.msra.mxu0 %v1751_v35 }
 0x188   : > { %1594 = vmatprep.subr.bf16.mxu0 %v2035_v0 }
 0x189   : > { %v801_v38 = vpop.f32.mrf.mxu0 }
 0x18a   : > { %v802_v40 = vadd.f32 %v1403_v36, %v801_v38  ;;  %v1752_v36 = vld [vmem:[#allocation13] sm:$0xff]  }
 0x18b   : > { %v1555_v41 = vpop.f32.mrf.mxu0  ;;  %1595 = vmatpush3.bf16.msra.mxu0 %v1752_v36 }
 0x18c   : > { %v805_v42 = vpack.c.bf16 %v802_v40, %v799_v39 }
 0x18e   : > { %943 = vrot.lane.b32.xlu1 %v805_v42, %s2037_s11  ;;  %1559 = vmatmul.mubr.msk.bf16.vlgmr.msra.gmra.mxu1 %vm815_vm1, %v805_v42 }
 0x18f   : > { %1564 = vmatprep.mubr.msk.bf16.mxu1 %vm2036_vm0, %v2035_v0  ;;  %1563 = vmatpush3.bf16.msra.mxu1 %v1743_v48 }
 0x190   : > { %1568 = vmatprep.subr.bf16.mxu1 %v2035_v0 }
 0x1e6   : > { %v951_v63 = vpop.permute.xlu1 %950 }
 0x1e7   : > { %v956_v2 = vsel %vm815_vm1, %v951_v63, 0 }
 0x200   : > { %v944_v3 = vpop.permute.xlu1 %943 }
 0x24e   : > { %v856_v49 = vpop.f32.mrf.mxu1 }
 0x24f   : > { %v864_v50 = vsel %vm863_vm2, %v856_v49, -inf }
 0x250   : > { %865 = vmax.xlane.f32.xlu0 %v864_v50  ;;  %v1560_v51 = vpop.f32.mrf.mxu1 }
 0x252   : > { %v859_v52 = vpop.f32.mrf.mxu1 }
 0x253   : > { %v867_v53 = vsel %vm863_vm2, %v859_v52, -inf }
 0x254   : > { %868 = vmax.xlane.f32.xlu0 %v867_v53  ;;  %v1561_v54 = vpop.f32.mrf.mxu1 }
 0x2d9   : > { %v866_v55 = vpop.xlane.xlu0 %865 }
 0x2da   : > { %v870_v56 = vsub.f32 %v856_v49, %v866_v55 }
 0x2dc   : > { %v872_v57 = vmul.f32 1.442695, %v870_v56  ;;  %v1421_v56 = vld [vmem:[%s2433_s7] ss:$0 sm:$0xff] }
 0x2dd   : > { %v869_v58 = vpop.xlane.xlu0 %868 }
 0x2de   : > { %v871_v59 = vsub.f32 %v859_v52, %v869_v58  ;;  %1753 = vpow2.f32 %v872_v57 }
 0x2e0   : > { %v874_v60 = vmul.f32 1.442695, %v871_v59 }
 0x2e2   : > { %1755 = vpow2.f32 %v874_v60 }
 0x2eb   : > { %v1754_v61 = vpop.eup %1753 }
 0x2ec   : > { %v876_v27 = vsel %vm863_vm2, %v1754_v61, 0.0 }
 0x2ef   : > { %v1756_v62 = vpop.eup %1755 }
 0x2f0   : > { %v882_v1 = vpack.c.bf16 %v1756_v62, %v1754_v61  ;;  %v879_v28 = vsel %vm863_vm2, %v1756_v62, 0.0 }
 0x2f2   : > { %1565 = vmatmul.mubr.msk.bf16.vlgmr.msra.gmra.mxu1 %vm863_vm2, %v882_v1 }
 0x2f3   : > { %1569 = vmatpush3.bf16.xpose.msra.mxu1 %v956_v2  ;;  %1570 = vmatprep.mubr.msk.bf16.mxu1 %vm2036_vm0, %v2035_v0 }
 0x2f4   : > { %1574 = vmatprep.subr.bf16.mxu1 %v2035_v0 }
 0x2fa   : > { %1571 = vmatmul.mubr.msk.bf16.vlgmr.msra.gmra.mxu1 %vm815_vm1, %v944_v3 }
 0x2fb   : > { %1576 = vmatprep.mubr.msk.bf16.mxu1 %vm2036_vm0, %v2035_v0 }
 0x3b2   : > { %v2345_v4 = vpop.f32.mrf.mxu1 }
 0x3b4   : > { %v1566_v5 = vpop.f32.mrf.mxu1 }
 0x3b6   : > { %v2347_v6 = vpop.f32.mrf.mxu1 }
 0x3b8   : > { %v1567_v7 = vpop.f32.mrf.mxu1 }
 0x3ba   : > { %v992_v8 = vpop.f32.mrf.mxu1 }
 0x3bb   : > { %v999_v9 = vsel %vm863_vm2, %v992_v8, -inf }
 0x3bc   : > { %1000 = vmax.xlane.f32.xlu0 %v999_v9  ;;  %v1572_v10 = vpop.f32.mrf.mxu1 }
 0x3be   : > { %v995_v11 = vpop.f32.mrf.mxu1 }
 0x3bf   : > { %v1002_v12 = vsel %vm863_vm2, %v995_v11, -inf }
 0x3c0   : > { %1003 = vmax.xlane.f32.xlu1 %v1002_v12  ;;  %v1573_v13 = vpop.f32.mrf.mxu1 }
 0x3d2   : > { %1023 = vrot.lane.b32.xlu0 %v1744_v14, %s2037_s11 }
 0x445   : > { %v1001_v15 = vpop.xlane.xlu0 %1000 }
 0x446   : > { %v1005_v16 = vsub.f32 %v992_v8, %v1001_v15 }
 0x448   : > { %v1007_v17 = vmul.f32 1.442695, %v1005_v16 }
 0x449   : > { %v1024_v18 = vpop.permute.xlu0 %1023  ;;  %v1004_v19 = vpop.xlane.xlu1 %1003 }
 0x44a   : > { %1757 = vpow2.f32 %v1007_v17  ;;  %v1006_v20 = vsub.f32 %v995_v11, %v1004_v19  ;;  %1575 = vmatpush3.bf16.msra.mxu1 %v1024_v18 }
 0x44c   : > { %v1009_v21 = vmul.f32 1.442695, %v1006_v20 }
 0x44e   : > { %1759 = vpow2.f32 %v1009_v21 }
 0x457   : > { %v1758_v22 = vpop.eup %1757 }
 0x458   : > { %v1011_v23 = vsel %vm863_vm2, %v1758_v22, 0.0 }
 0x459   : > { %1012 = vadd.xlane.f32.xlu0 %v1011_v23 }
 0x45b   : > { %v1760_v24 = vpop.eup %1759 }
 0x45c   : > { %v1014_v25 = vsel %vm863_vm2, %v1760_v24, 0.0  ;;  %v1017_v26 = vpack.c.bf16 %v1760_v24, %v1758_v22 }
 0x45d   : > { %1015 = vadd.xlane.f32.xlu1 %v1014_v25 }
 0x45e   : > { %1577 = vmatmul.mubr.msk.bf16.vlgmr.msra.gmra.mxu1 %vm863_vm2, %v1017_v26 }
 0x461   : > { %877 = vadd.xlane.f32.xlu1 %v876_v27 }
 0x465   : > { %880 = vadd.xlane.f32.xlu1 %v879_v28 }
 0x4e2   : > { %v1013_v37 = vpop.xlane.xlu0 %1012 }
 0x4e3   : > { %1761 = vrcp.f32 %v1013_v37 }
 0x4e6   : > { %v1016_v38 = vpop.xlane.xlu1 %1015 }
 0x4e7   : > { %1763 = vrcp.f32 %v1016_v38 }
 0x4ea   : > { %v878_v48 = vpop.xlane.xlu1 %877 }
 0x4ee   : > { %v881_v49 = vpop.xlane.xlu1 %880 }
 0x4ef   : > { %1765 = vrcp.f32 %v881_v49 }
 0x4f0   : > { %v1762_v41 = vpop.eup %1761  ;;  %1767 = vrcp.f32 %v878_v48 }
 0x4f4   : > { %v1764_v42 = vpop.eup %1763 }
 0x4fc   : > { %v1766_v0 = vpop.eup %1765 }
 0x4fd   : > { %v1768_v50 = vpop.eup %1767  ;;  %v936_v51 = vmul.f32 %v1766_v0, %v2347_v6 }
 0x4fe   : > { %v935_v52 = vmul.f32 %v1768_v50, %v2345_v4 }
 0x500   : > { %v937_v53 = vpack.c.bf16 %v936_v51, %v935_v52 }
 0x51e   : > { %v1063_v39 = vpop.f32.mrf.mxu1 }
 0x51f   : > { %v1072_v44 = vmul.f32 %v1762_v41, %v1063_v39 }
 0x520   : > { %v1578_v40 = vpop.f32.mrf.mxu1 }
 0x522   : > { %v1066_v43 = vpop.f32.mrf.mxu1 }
 0x523   : > { %v1073_v45 = vmul.f32 %v1764_v42, %v1066_v43 }
 0x524   : > { %v1579_v46 = vpop.f32.mrf.mxu1 }
 0x525   : > { %v1074_v47 = vpack.c.bf16 %v1073_v45, %v1072_v44 }
 0x527   : > { %1076 = vrot.lane.b32.xlu1 %v1074_v47, %s2037_s11 }
 0x599   : > { %v1077_v54 = vpop.permute.xlu1 %1076 }
 0x59a   : > { %v1080_v55 = vsel %vm815_vm1, %v937_v53, %v1077_v54 }
 0x59b   : > { %1597 = vmatmul.mubr.bf16.vlgmr.msra.gmra.mxu0 %v1080_v55 }
 0x65b   : > { %v1187_v57 = vpop.f32.mrf.mxu0 }
 0x65c   : > { %v1188_v58 = vadd.f32 %v1421_v56, %v1187_v57 }
 0x65d   : > { %v1598_v59 = vpop.f32.mrf.mxu0 }
 0x65e   : > { %1194 = vst [vmem:[%s439_s12] sm:$0xff] %v1188_v58 }
 0x65f   : > { %v1190_v60 = vpop.f32.mrf.mxu0 }
 0x660   : > { %v1191_v61 = vadd.f32 %v1421_v56, %v1190_v60 }
 0x661   : > { %v1599_v62 = vpop.f32.mrf.mxu0 }
 0x662   : > { %1195 = vst [vmem:[%s439_s12 + $0x8] sm:$0xff] %v1191_v61 }
 0x663   : > { %1942 = shalt.err (!%p1939_p8)
}
 0x664   : > { %s1943_s6 = scalar_lea.hbm %s2378_s19, 256  ;;  %s1947_s13 = scalar_lea.hbm %s2434_s8, 512 }
 0x665   : > { %p1944_p2 = scmp.ne.s32.totalorder %s2378_s19, %s1943_s6  ;;  %p1948_p3 = scmp.lt.s32.totalorder %s2378_s19, %s2434_s8 }
 0x666   : > { %p1949_p5 = scmp.lt.s32.totalorder %s1947_s13, %s1943_s6 }
 0x667   : > { %p1945_p11 = pnand %p1944_p2, %p2205_p0 }
 0x668   : > { %p1950_p4 = por %p1949_p5, %p1948_p3 }
 0x669   : > { %p1946_p13 = pneg %p1945_p11 }
 0x66b   : > { %p1951_p10 = pnand %p1950_p4, %p1946_p13 }
 0x66d   : > { %1954 = shalt.err (!%p1951_p10)
}
 0x66e   : > { %s2039_s5 = smov 128   ;;  %s2040_s26 = smov 8  }
 0x66f   : > { %1620 = dma.vmem_to_hbm [thread:$0]  (%p2205_p0), %s2373_s23, 256, %s2378_s19, %s1197_s2, %s2039_s5, %s2039_s5, %s2040_s26  }
 0x670 PF: > { %s1227_s12 = sand.u32 1, %s2005_s27   ;;  %p2468_p12 = scmp.ge.s32.totalorder %s2025_s10, 2 }
 0x671   : > { %s1228_s25 = scalar_lea.sflag [#allocation6], %s1227_s12 }
 0x672   : > { %p1643_p7 = pnand %p2468_p12, %p2131_p6 }
 0x674   : > { %p1644_p1 = pneg %p1643_p7 }
 0x676   : > { %2000 = dma.done.wait (%p1644_p1), %s1228_s25, 256  }
 0x677   : > { %2002 = vsyncadd (%p1644_p1), %s1228_s25, 4294967040  ;;  %s29_s10 = sadd.s32 1, %s2025_s10   ;;  %s2469_s17 = sld [smem:[#allocation22_spill]] }
 0x678   : > { %p26_p9 = scmp.ge.s32.totalorder %s29_s10, 4   ;;  %s2470_s27 = smov %s2009_s28 }
 0x679   : > { %s2471_s28 = smov %s2013_s29  ;;  %s2472_s29 = smov %s2216_s16 }
 0x67a   : > { %s2473_s30 = smov %s2021_s9  ;;  %28 = sbr.rel (!%p26_p9) target bundleno = 17 (0x11), region = 130 }
 0x67d   : > { %s2474_s9 = smov %s2469_s17 }
 0x67f   :  { %1233 = vsyncpa [#allocation5], 1 }
 0x680   :  { %1235 = vsyncpa [#allocation5 + $0x1], 1 }
 0x681   :  { %1236 = vsyncpa [#allocation8], 1 }
 0x682   :  { %1238 = vsyncpa [#allocation8 + $0x1], 1 }
 0x683   :  { %1239 = vsyncpa [#allocation11], 1 }
 0x684   :  { %1240 = vsyncpa [#allocation14], 1 }
 0x685   :  { %1241 = vsyncpa [#allocation6], 1 }
 0x686   :  { %1243 = vsyncpa [#allocation6 + $0x1], 1 }

</bundles_post_ra>
